<compile_context>
chip_gen: v6e
topology: v6e:2x2x1
jax: 0.10.0
libtpu: 0.0.40
codegen_flags: <defaults>
</compile_context>

<pallas_src>
import math

import jax
import jax.numpy as jnp
from jax.experimental import pallas as pl
from jax.experimental.pallas import tpu as pltpu

F_PAD = 128  # mid_n / action_n padded to one lane tile; kernel is DMA/overhead
             # bound, so no benefit from padding features beyond 128.


def _round_up(n, m):
    return ((n + m - 1) // m) * m


def _layer_chain(h, w_ref, b_ref, k):
    """4x (Linear [+ReLU]) chain on one row block.

    Dot inputs are cast to the weight dtype (f32 or bf16); accumulation and the
    bias-add / ReLU epilogue stay f32.
    """
    wd = w_ref.dtype
    # Layer 1: only the first k (= state_n) rows of the padded weight are real.
    h = jnp.maximum(
        jnp.dot(h.astype(wd), w_ref[0, :k, :], preferred_element_type=jnp.float32)
        + b_ref[0:1, :], 0.0)
    h = jnp.maximum(
        jnp.dot(h.astype(wd), w_ref[1], preferred_element_type=jnp.float32)
        + b_ref[1:2, :], 0.0)
    h = jnp.maximum(
        jnp.dot(h.astype(wd), w_ref[2], preferred_element_type=jnp.float32)
        + b_ref[2:3, :], 0.0)
    return (jnp.dot(h.astype(wd), w_ref[3], preferred_element_type=jnp.float32)
            + b_ref[3:4, :])


def mlp_kernel(x_ref, w_ref, b_ref, o_ref):
    # x_ref: [TB, state_n]  w_ref: [4, 128, 128]  b_ref: [8, 128]  o_ref: [TB, 128]
    tb, k = x_ref.shape
    if tb >= 16 and tb % 16 == 0:
        # Two independent half-tile chains in one basic block: the LLO
        # scheduler interleaves their vmatmul pushes to hide MXU result-FIFO
        # latency (mainly a v5e/v6e win; harmless on v7x's MRB).
        half = tb // 2
        o_ref[:half, :] = _layer_chain(x_ref[:half, :], w_ref, b_ref, k).astype(o_ref.dtype)
        o_ref[half:, :] = _layer_chain(x_ref[half:, :], w_ref, b_ref, k).astype(o_ref.dtype)
    else:
        o_ref[...] = _layer_chain(x_ref[...], w_ref, b_ref, k).astype(o_ref.dtype)


def pack_params(params, *, weight_dtype=jnp.float32):
    """Pad + stack the 4 weights into one [4,128,128] operand and the 4 biases
    into one (8,128) f32 tile.  Call ONCE at init and reuse — doing this per
    forward costs more than the pallas_call itself.

    Zero padding is mathematically inert: padded input columns are 0, padded
    weight rows/cols are 0, padded bias lanes are 0, and ReLU(0)=0, so the
    first action_n output columns are exact.
    """
    ws, bs = zip(*params)
    w_stack = jnp.zeros((4, F_PAD, F_PAD), weight_dtype)
    for i, w in enumerate(ws):
        w_stack = w_stack.at[i, : w.shape[0], : w.shape[1]].set(w.astype(weight_dtype))
    b_stack = jnp.zeros((8, F_PAD), jnp.float32)
    for i, b in enumerate(bs):
        b = b.reshape(-1)
        b_stack = b_stack.at[i, : b.shape[0]].set(b.astype(jnp.float32))
    state_n = ws[0].shape[0]
    action_n = ws[3].shape[1]
    return w_stack, b_stack, state_n, action_n


def _choose_tb(batch, tb):
    batch8 = _round_up(batch, 8)
    if tb is None:
        tb = min(512, batch8)              # big tiles amortize per-step overhead
        if batch8 >= 16 and pl.cdiv(batch8, tb) < 2:
            # keep >= 2 grid blocks so the "parallel" axis can split across
            # both TensorCores on v7x (no-op on v5e/v6e).
            tb = _round_up(pl.cdiv(batch8, 2), 8)
    tb = max(8, min(_round_up(tb, 8), batch8))   # never pad phantom zero rows
    return tb


def mlp_forward(x, w_stack, b_stack, action_n, *, tb=None):
    """x: [batch, state_n] float32.  w_stack/b_stack from pack_params()."""
    batch, state_n = x.shape
    tb = _choose_tb(batch, tb)
    n_blocks = pl.cdiv(batch, tb)
    batch_pad = n_blocks * tb
    if batch_pad == batch:
        x_pad = x
    else:
        x_pad = jnp.zeros((batch_pad, state_n), x.dtype).at[:batch].set(x)

    out_pad = pl.pallas_call(
        mlp_kernel,
        out_shape=jax.ShapeDtypeStruct((batch_pad, F_PAD), jnp.float32),
        grid_spec=pl.GridSpec(
            grid=(n_blocks,),
            in_specs=[
                pl.BlockSpec((tb, state_n), lambda i: (i, 0)),         # x: streamed, unpadded K
                pl.BlockSpec((4, F_PAD, F_PAD), lambda i: (0, 0, 0)),  # weights: VMEM-resident
                pl.BlockSpec((8, F_PAD), lambda i: (0, 0)),            # biases: VMEM-resident
            ],
            out_specs=pl.BlockSpec((tb, F_PAD), lambda i: (i, 0)),     # lane-dense store
        ),
        compiler_params=pltpu.CompilerParams(
            dimension_semantics=("parallel",),
        ),
    )(x_pad, w_stack, b_stack)

    return out_pad[:batch, :action_n]


def init_linear(key, fan_in, fan_out):
    """Deterministic init mimicking PyTorch nn.Linear default:
    U(-1/sqrt(fan_in), 1/sqrt(fan_in)) for both weight and bias."""
    kw, kb = jax.random.split(key)
    bound = 1.0 / math.sqrt(fan_in)
    w = jax.random.uniform(kw, (fan_in, fan_out), jnp.float32, -bound, bound)
    b = jax.random.uniform(kb, (1, fan_out), jnp.float32, -bound, bound)
    return w, b


def reference_mlp(x, params):
    (w1, b1), (w2, b2), (w3, b3), (w4, b4) = params
    h = jnp.maximum(x @ w1 + b1, 0.0)
    h = jnp.maximum(h @ w2 + b2, 0.0)
    h = jnp.maximum(h @ w3 + b3, 0.0)
    return h @ w4 + b4


if __name__ == "__main__":
    # LunarLanderContinuous-v2: state_n = 8, action_n = 2.
    state_n, action_n, mid_n = 8, 2, 32
    batch = 64  # small, but enough rows to exercise the batch grid (2 blocks)

    key = jax.random.PRNGKey(0)
    kx, k1, k2, k3, k4 = jax.random.split(key, 5)

    x = jax.random.normal(kx, (batch, state_n), jnp.float32)
    params = (
        init_linear(k1, state_n, mid_n),
        init_linear(k2, mid_n, mid_n),
        init_linear(k3, mid_n, mid_n),
        init_linear(k4, mid_n, action_n),
    )

    # Packed operands built ONCE (hoisted out of the hot path).
    w_stack, b_stack, sn, an = pack_params(params)

    out = jax.block_until_ready(mlp_forward(x, w_stack, b_stack, an))
    ref = reference_mlp(x, params)
    assert out.shape == (batch, action_n)
    assert jnp.allclose(out, ref, atol=1e-5, rtol=1e-5)

    # Optional bf16-matmul path (native MXU throughput); exercised for compile
    # coverage only — bf16 necessarily breaks the 1e-5 tolerance, so just check
    # shape / finiteness here.
    w_bf16, b_f32, _, _ = pack_params(params, weight_dtype=jnp.bfloat16)
    out_bf16 = jax.block_until_ready(mlp_forward(x, w_bf16, b_f32, an))
    assert out_bf16.shape == (batch, action_n)
    assert bool(jnp.all(jnp.isfinite(out_bf16)))

    print("KERNEL_OK")
</pallas_src>

<mosaic_0001>
module attributes {stable_mosaic.version = 11 : i64} {
  func.func @mlp_kernel(%arg0: i32, %arg1: memref<32x8xf32, #tpu.memory_space<vmem>>, %arg2: memref<4x128x128xf32, #tpu.memory_space<vmem>>, %arg3: memref<8x128xf32, #tpu.memory_space<vmem>>, %arg4: memref<32x128xf32, #tpu.memory_space<vmem>>) attributes {dimension_semantics = [#tpu.dimension_semantics<parallel>], iteration_bounds = array<i64: 2>, scalar_prefetch = 0 : i64, scratch_operands = 0 : i64, tpu.core_type = #tpu.core_type<tc>, window_params = [{transform_indices = @transform_0, window_bounds = array<i64: 32, 8>}, {pipeline_mode = #tpu.pipeline_mode<synchronous>, transform_indices = @transform_1, window_bounds = array<i64: 4, 128, 128>}, {pipeline_mode = #tpu.pipeline_mode<synchronous>, transform_indices = @transform_2, window_bounds = array<i64: 8, 128>}, {transform_indices = @transform_3, window_bounds = array<i64: 32, 128>}]} {
    %c0 = arith.constant 0 : index
    %c0_0 = arith.constant 0 : index
    %0 = vector.load %arg1[%c0, %c0_0] : memref<32x8xf32, #tpu.memory_space<vmem>>, vector<16x8xf32>
    %c0_1 = arith.constant 0 : index
    %c0_2 = arith.constant 0 : index
    %c0_3 = arith.constant 0 : index
    %1 = vector.load %arg2[%c0_1, %c0_2, %c0_3] : memref<4x128x128xf32, #tpu.memory_space<vmem>>, vector<1x8x128xf32>
    %2 = vector.shape_cast %1 : vector<1x8x128xf32> to vector<8x128xf32>
    %cst = arith.constant dense<0.000000e+00> : vector<16x128xf32>
    %3 = tpu.matmul %0, %2, %cst {dimension_numbers = #tpu.dot_dimension_numbers<[1], [0], [0], [1], [0, 0, 1, 1], [], []>} : vector<16x8xf32>, vector<8x128xf32>, vector<16x128xf32> -> vector<16x128xf32>
    %c0_4 = arith.constant 0 : index
    %c0_5 = arith.constant 0 : index
    %4 = vector.load %arg3[%c0_4, %c0_5] : memref<8x128xf32, #tpu.memory_space<vmem>>, vector<1x128xf32>
    %5 = vector.broadcast %4 : vector<1x128xf32> to vector<16x128xf32>
    %6 = arith.addf %3, %5 : vector<16x128xf32>
    %cst_6 = arith.constant 0.000000e+00 : f32
    %7 = vector.broadcast %cst_6 : f32 to vector<16x128xf32>
    %8 = arith.maximumf %6, %7 : vector<16x128xf32>
    %c1 = arith.constant 1 : index
    %c0_7 = arith.constant 0 : index
    %c0_8 = arith.constant 0 : index
    %9 = vector.load %arg2[%c1, %c0_7, %c0_8] : memref<4x128x128xf32, #tpu.memory_space<vmem>>, vector<1x128x128xf32>
    %10 = vector.shape_cast %9 : vector<1x128x128xf32> to vector<128x128xf32>
    %cst_9 = arith.constant dense<0.000000e+00> : vector<16x128xf32>
    %11 = tpu.matmul %8, %10, %cst_9 {dimension_numbers = #tpu.dot_dimension_numbers<[1], [0], [0], [1], [0, 0, 1, 1], [], []>} : vector<16x128xf32>, vector<128x128xf32>, vector<16x128xf32> -> vector<16x128xf32>
    %c1_10 = arith.constant 1 : index
    %c0_11 = arith.constant 0 : index
    %12 = vector.load %arg3[%c1_10, %c0_11] : memref<8x128xf32, #tpu.memory_space<vmem>>, vector<1x128xf32>
    %13 = vector.broadcast %12 : vector<1x128xf32> to vector<16x128xf32>
    %14 = arith.addf %11, %13 : vector<16x128xf32>
    %cst_12 = arith.constant 0.000000e+00 : f32
    %15 = vector.broadcast %cst_12 : f32 to vector<16x128xf32>
    %16 = arith.maximumf %14, %15 : vector<16x128xf32>
    %c2 = arith.constant 2 : index
    %c0_13 = arith.constant 0 : index
    %c0_14 = arith.constant 0 : index
    %17 = vector.load %arg2[%c2, %c0_13, %c0_14] : memref<4x128x128xf32, #tpu.memory_space<vmem>>, vector<1x128x128xf32>
    %18 = vector.shape_cast %17 : vector<1x128x128xf32> to vector<128x128xf32>
    %cst_15 = arith.constant dense<0.000000e+00> : vector<16x128xf32>
    %19 = tpu.matmul %16, %18, %cst_15 {dimension_numbers = #tpu.dot_dimension_numbers<[1], [0], [0], [1], [0, 0, 1, 1], [], []>} : vector<16x128xf32>, vector<128x128xf32>, vector<16x128xf32> -> vector<16x128xf32>
    %c2_16 = arith.constant 2 : index
    %c0_17 = arith.constant 0 : index
    %20 = vector.load %arg3[%c2_16, %c0_17] : memref<8x128xf32, #tpu.memory_space<vmem>>, vector<1x128xf32>
    %21 = vector.broadcast %20 : vector<1x128xf32> to vector<16x128xf32>
    %22 = arith.addf %19, %21 : vector<16x128xf32>
    %cst_18 = arith.constant 0.000000e+00 : f32
    %23 = vector.broadcast %cst_18 : f32 to vector<16x128xf32>
    %24 = arith.maximumf %22, %23 : vector<16x128xf32>
    %c3 = arith.constant 3 : index
    %c0_19 = arith.constant 0 : index
    %c0_20 = arith.constant 0 : index
    %25 = vector.load %arg2[%c3, %c0_19, %c0_20] : memref<4x128x128xf32, #tpu.memory_space<vmem>>, vector<1x128x128xf32>
    %26 = vector.shape_cast %25 : vector<1x128x128xf32> to vector<128x128xf32>
    %cst_21 = arith.constant dense<0.000000e+00> : vector<16x128xf32>
    %27 = tpu.matmul %24, %26, %cst_21 {dimension_numbers = #tpu.dot_dimension_numbers<[1], [0], [0], [1], [0, 0, 1, 1], [], []>} : vector<16x128xf32>, vector<128x128xf32>, vector<16x128xf32> -> vector<16x128xf32>
    %c3_22 = arith.constant 3 : index
    %c0_23 = arith.constant 0 : index
    %28 = vector.load %arg3[%c3_22, %c0_23] : memref<8x128xf32, #tpu.memory_space<vmem>>, vector<1x128xf32>
    %29 = vector.broadcast %28 : vector<1x128xf32> to vector<16x128xf32>
    %30 = arith.addf %27, %29 : vector<16x128xf32>
    %c0_24 = arith.constant 0 : index
    %c0_25 = arith.constant 0 : index
    %31 = vector.load %arg4[%c0_24, %c0_25] : memref<32x128xf32, #tpu.memory_space<vmem>>, vector<16x128xf32>
    tpu.vector_store %arg4[%c0_24, %c0_25], %30 {strides = array<i32>} : memref<32x128xf32, #tpu.memory_space<vmem>>, vector<16x128xf32>,
    %c16 = arith.constant 16 : index
    %c0_26 = arith.constant 0 : index
    %32 = vector.load %arg1[%c16, %c0_26] : memref<32x8xf32, #tpu.memory_space<vmem>>, vector<16x8xf32>
    %c0_27 = arith.constant 0 : index
    %c0_28 = arith.constant 0 : index
    %c0_29 = arith.constant 0 : index
    %33 = vector.load %arg2[%c0_27, %c0_28, %c0_29] : memref<4x128x128xf32, #tpu.memory_space<vmem>>, vector<1x8x128xf32>
    %34 = vector.shape_cast %33 : vector<1x8x128xf32> to vector<8x128xf32>
    %cst_30 = arith.constant dense<0.000000e+00> : vector<16x128xf32>
    %35 = tpu.matmul %32, %34, %cst_30 {dimension_numbers = #tpu.dot_dimension_numbers<[1], [0], [0], [1], [0, 0, 1, 1], [], []>} : vector<16x8xf32>, vector<8x128xf32>, vector<16x128xf32> -> vector<16x128xf32>
    %c0_31 = arith.constant 0 : index
    %c0_32 = arith.constant 0 : index
    %36 = vector.load %arg3[%c0_31, %c0_32] : memref<8x128xf32, #tpu.memory_space<vmem>>, vector<1x128xf32>
    %37 = vector.broadcast %36 : vector<1x128xf32> to vector<16x128xf32>
    %38 = arith.addf %35, %37 : vector<16x128xf32>
    %cst_33 = arith.constant 0.000000e+00 : f32
    %39 = vector.broadcast %cst_33 : f32 to vector<16x128xf32>
    %40 = arith.maximumf %38, %39 : vector<16x128xf32>
    %c1_34 = arith.constant 1 : index
    %c0_35 = arith.constant 0 : index
    %c0_36 = arith.constant 0 : index
    %41 = vector.load %arg2[%c1_34, %c0_35, %c0_36] : memref<4x128x128xf32, #tpu.memory_space<vmem>>, vector<1x128x128xf32>
    %42 = vector.shape_cast %41 : vector<1x128x128xf32> to vector<128x128xf32>
    %cst_37 = arith.constant dense<0.000000e+00> : vector<16x128xf32>
    %43 = tpu.matmul %40, %42, %cst_37 {dimension_numbers = #tpu.dot_dimension_numbers<[1], [0], [0], [1], [0, 0, 1, 1], [], []>} : vector<16x128xf32>, vector<128x128xf32>, vector<16x128xf32> -> vector<16x128xf32>
    %c1_38 = arith.constant 1 : index
    %c0_39 = arith.constant 0 : index
    %44 = vector.load %arg3[%c1_38, %c0_39] : memref<8x128xf32, #tpu.memory_space<vmem>>, vector<1x128xf32>
    %45 = vector.broadcast %44 : vector<1x128xf32> to vector<16x128xf32>
    %46 = arith.addf %43, %45 : vector<16x128xf32>
    %cst_40 = arith.constant 0.000000e+00 : f32
    %47 = vector.broadcast %cst_40 : f32 to vector<16x128xf32>
    %48 = arith.maximumf %46, %47 : vector<16x128xf32>
    %c2_41 = arith.constant 2 : index
    %c0_42 = arith.constant 0 : index
    %c0_43 = arith.constant 0 : index
    %49 = vector.load %arg2[%c2_41, %c0_42, %c0_43] : memref<4x128x128xf32, #tpu.memory_space<vmem>>, vector<1x128x128xf32>
    %50 = vector.shape_cast %49 : vector<1x128x128xf32> to vector<128x128xf32>
    %cst_44 = arith.constant dense<0.000000e+00> : vector<16x128xf32>
    %51 = tpu.matmul %48, %50, %cst_44 {dimension_numbers = #tpu.dot_dimension_numbers<[1], [0], [0], [1], [0, 0, 1, 1], [], []>} : vector<16x128xf32>, vector<128x128xf32>, vector<16x128xf32> -> vector<16x128xf32>
    %c2_45 = arith.constant 2 : index
    %c0_46 = arith.constant 0 : index
    %52 = vector.load %arg3[%c2_45, %c0_46] : memref<8x128xf32, #tpu.memory_space<vmem>>, vector<1x128xf32>
    %53 = vector.broadcast %52 : vector<1x128xf32> to vector<16x128xf32>
    %54 = arith.addf %51, %53 : vector<16x128xf32>
    %cst_47 = arith.constant 0.000000e+00 : f32
    %55 = vector.broadcast %cst_47 : f32 to vector<16x128xf32>
    %56 = arith.maximumf %54, %55 : vector<16x128xf32>
    %c3_48 = arith.constant 3 : index
    %c0_49 = arith.constant 0 : index
    %c0_50 = arith.constant 0 : index
    %57 = vector.load %arg2[%c3_48, %c0_49, %c0_50] : memref<4x128x128xf32, #tpu.memory_space<vmem>>, vector<1x128x128xf32>
    %58 = vector.shape_cast %57 : vector<1x128x128xf32> to vector<128x128xf32>
    %cst_51 = arith.constant dense<0.000000e+00> : vector<16x128xf32>
    %59 = tpu.matmul %56, %58, %cst_51 {dimension_numbers = #tpu.dot_dimension_numbers<[1], [0], [0], [1], [0, 0, 1, 1], [], []>} : vector<16x128xf32>, vector<128x128xf32>, vector<16x128xf32> -> vector<16x128xf32>
    %c3_52 = arith.constant 3 : index
    %c0_53 = arith.constant 0 : index
    %60 = vector.load %arg3[%c3_52, %c0_53] : memref<8x128xf32, #tpu.memory_space<vmem>>, vector<1x128xf32>
    %61 = vector.broadcast %60 : vector<1x128xf32> to vector<16x128xf32>
    %62 = arith.addf %59, %61 : vector<16x128xf32>
    %c16_54 = arith.constant 16 : index
    %c0_55 = arith.constant 0 : index
    %63 = vector.load %arg4[%c16_54, %c0_55] : memref<32x128xf32, #tpu.memory_space<vmem>>, vector<16x128xf32>
    tpu.vector_store %arg4[%c16_54, %c0_55], %62 {strides = array<i32>} : memref<32x128xf32, #tpu.memory_space<vmem>>, vector<16x128xf32>,
    return
  }
  func.func @transform_0(%arg0: i32) -> (i32, i32) {
    %c0_i32 = arith.constant 0 : i32
    %c0_i32_0 = arith.constant 0 : i32
    return %arg0, %c0_i32 : i32, i32
  }
  func.func @transform_1(%arg0: i32) -> (i32, i32, i32) {
    %c0_i32 = arith.constant 0 : i32
    %c0_i32_0 = arith.constant 0 : i32
    %c0_i32_1 = arith.constant 0 : i32
    %c0_i32_2 = arith.constant 0 : i32
    return %c0_i32, %c0_i32_0, %c0_i32_1 : i32, i32, i32
  }
  func.func @transform_2(%arg0: i32) -> (i32, i32) {
    %c0_i32 = arith.constant 0 : i32
    %c0_i32_0 = arith.constant 0 : i32
    %c0_i32_1 = arith.constant 0 : i32
    return %c0_i32, %c0_i32_0 : i32, i32
  }
  func.func @transform_3(%arg0: i32) -> (i32, i32) {
    %c0_i32 = arith.constant 0 : i32
    %c0_i32_0 = arith.constant 0 : i32
    return %arg0, %c0_i32 : i32, i32
  }
}

</mosaic_0001>

<bundles_post_ra>
// kernel: tpu_custom_call.1
= control target key start
LH: loop header
LB: loop body
LE: loop exit
PB: predicated region body
PF: predicated region fallthrough
CT: control target
= control target key end

     0   :  { %8 = vsyncpa [#allocation3], 0  ;;  %s2039_s0 = inlined_call_operand.vmem [shape: f32[64,8], index: 0, kind: input, shape index: {}]   ;;  %s2040_s1 = inlined_call_operand.hbm [shape: f32[4,128,128], index: 1, kind: input, shape index: {}]   ;;  %s2041_s2 = inlined_call_operand.vmem [shape: f32[8,128], index: 2, kind: input, shape index: {}]   ;;  %s2042_s3 = inlined_call_operand.hbm [shape: f32[64,128], index: 3, kind: output, shape index: {}]  }
   0x1   :  { %9 = vsyncpa [#allocation4], 0 }
   0x2   :  { %11 = vsyncpa [#allocation4 + $0x1], 0  ;;  %s1582_s12 = smov 0   ;;  %s1584_s13 = smov 0  }
   0x3   :  { %s1586_s14 = smov 0   ;;  %s1588_s15 = smov 0  }
   0x4 LB: > { %s1603_s16 = sadd.s32 4294967295, %s1554_s15   ;;  %s1049_s17 = sadd.s32 4294967294, %s1554_s15   ;;  %s1554_s15 = sphi %s1588_s15, %s2050_s15   ;;  %s1550_s14 = sphi %s1586_s14, %s2049_s14   ;;  %s1546_s13 = sphi %s1584_s13, %s2048_s13   ;;  %s1542_s12 = sphi %s1582_s12, %s2047_s12  }
   0x5   : > { %s1607_s18 = sadd.s32 1, %s1554_s15   ;;  %s92_s19 = sadd.s32 1, %s1550_s14 }
   0x6   : > { %s89_s20 = ssub.s32 %s1554_s15, %s1607_s18  ;;  %p102_p0 = scmp.ne.s32.totalorder %s1550_s14, %s1546_s13 }
   0x7   : > { %p90_p1 = scmp.eq.s32.totalorder %s89_s20, 0  ;;  %p103_p2 = scmp.eq.s32.totalorder %s1603_s16, 1 }
   0x8   : > { %p108_p3 = scmp.ne.s32.totalorder %s1546_s13, %s1542_s12  ;;  %p109_p4 = scmp.eq.s32.totalorder %s1049_s17, 1 }
   0x9   : > { %s1618_s21 = scalar_select %p90_p1, %s1550_s14, %s92_s19  }
   0xa   : > { %p1620_p5 = por %p103_p2, %p102_p0  ;;  %p1624_p6 = por %p109_p4, %p108_p3 }
   0xb   : > { %p1050_p7 = scmp.ge.s32.totalorder %s1554_s15, 1  ;;  %p116_p8 = scmp.lt.s32.totalorder %s1554_s15, 3 }
   0xc   : > { %s2044_s23 = scalar_select %p1624_p6, 1, 0 }
   0xd   : > { %p1424_p9 = scmp.eq.s32.totalorder %s1603_s16, 0  ;;  %p1631_p10 = pnand %p1050_p7, %p116_p8 }
   0xe   : > { %s1556_s25 = smov [#allocation2]  }
   0xf   : > { %s128_s26 = sshll.u32 %s1556_s25, 4  ;;  %p1416_p11 = pneg %p1631_p10  ;;  %s129_s26 = int_to_ptr.vmem [resolvable:$true] %s128_s26 }
  0x10   : > { %s1475_s27 = scalar_lea.vmem %s129_s26, 8192  ;;  %p1483_p3 = scmp.lt.s32.totalorder %s129_s26, %s129_s26 }
  0x11   : > { %p1417_p12 = pnand %p1424_p9, %p1416_p11  ;;  %p1476_p0 = scmp.ne.s32.totalorder %s129_s26, %s1475_s27 }
  0x12   : > { %p1484_p4 = scmp.lt.s32.totalorder %s1475_s27, %s1475_s27 }
  0x13   : > { %p1466_p13 = pneg %p1417_p12 }
  0x14   : > { %p1485_p6 = por %p1484_p4, %p1483_p3 }
  0x15   : > { %p1478_p1 = pnand %p1476_p0, %p1466_p13 }
  0x17   : > { %p1479_p2 = pneg %p1478_p1 }
  0x19   : > { %p1486_p7 = pnand %p1485_p6, %p1479_p2 }
  0x1b   : > { %1489 = shalt.err (!%p1486_p7)
}
  0x1c   : > { %s1557_s28 = smov 128   ;;  %s1558_s29 = smov 8  }
  0x1d   : > { %1419 = dma.hbm_to_vmem [thread:$0]  (!%p1417_p12), %s2040_s1, 8192, %s129_s26, [#allocation3], %s1557_s28, %s1557_s28, %s1558_s29  }
  0x1e   : > { %156 = sbr.rel (%p1631_p10) target bundleno = 1259 (0x4eb), region = 32 }
  0x23   : > { %1533 = dma.done.wait (%p1424_p9), [#allocation3], 8192  }
  0x24   : > { %1535 = vsyncadd (%p1424_p9), [#allocation3], 4294959104  ;;  %s1056_s5 = sshll.u32 %s1603_s16, 2  ;;  %vm195_vm0 = vcmask 64512   ;;  %v1654_v0 = vld [vmem:[#allocation2] sm:$0xff]  ;;  %v1660_v3 = vld [vmem:[#allocation2 + $0xf8] sm:$0xff] }
  0x25   : > { %p181_p8 = scmp.lt.s32.totalorder %s1056_s5, 7  ;;  %1190 = vmatprep.subr.mxu1 %v1654_v0  ;;  %v1663_v4 = vld [vmem:[#allocation2 + $0xf0] sm:$0xff]  ;;  %v1668_v5 = vld [vmem:[#allocation2 + $0xe8] sm:$0xff]  ;;  %v1672_v6 = vld [vmem:[#allocation2 + $0xe0] sm:$0xff]  ;;  %s177_s25 = sand.u32 1, %s1546_s13  }
  0x26   : > { %1191 = vmatpush3.msra.mxu1 %v1654_v0  ;;  %v1676_v7 = vld [vmem:[#allocation2 + $0xd8] sm:$0xff]  ;;  %v1680_v8 = vld [vmem:[#allocation2 + $0xd0] sm:$0xff]  ;;  %v1684_v9 = vld [vmem:[#allocation2 + $0xc8] sm:$0xff]  ;;  %s1055_s26 = sshll.u32 %s177_s25, 5  ;;  %s1075_s4 = sshll.u32 %s1603_s16, 9 }
  0x27   : > { %s2052_s5 = smov (!%p181_p8, %s1056_s5), 7  ;;  %1195 = vmatprep.subr.mxu1 %v1660_v3  ;;  %v1688_v10 = vld [vmem:[#allocation2 + $0xc0] sm:$0xff]  ;;  %v1692_v11 = vld [vmem:[#allocation2 + $0xb8] sm:$0xff]  ;;  %v1696_v12 = vld [vmem:[#allocation2 + $0xb0] sm:$0xff]  ;;  %s179_s29 = scalar_lea.vmem [#allocation5], %s1055_s26 }
  0x28   : > { %s1057_s6 = sshll.u32 %s2052_s5, 3  ;;  %v1700_v13 = vld [vmem:[#allocation2 + $0xa8] sm:$0xff]  ;;  %v1704_v14 = vld [vmem:[#allocation2 + $0xa0] sm:$0xff]  ;;  %v1710_v15 = vld [vmem:[#allocation2 + $0x98] sm:$0xff]  ;;  %s975_s30 = sshll.u32 %s179_s29, 4  ;;  %s1990_s30 = int_to_ptr.vmem [resolvable:$true] %s975_s30 }
  0x29   : > { %s1652_s9 = scalar_lea.vmem %s2039_s0, %s1057_s6  ;;  %v1714_v16 = vld [vmem:[#allocation2 + $0x90] sm:$0xff]  ;;  %v1718_v17 = vld [vmem:[#allocation2 + $0x88] sm:$0xff]  ;;  %v1722_v18 = vld [vmem:[#allocation2 + $0x80] sm:$0xff]  ;;  %s1995_s7 = scalar_lea.hbm %s2042_s3, %s1075_s4 }
  0x2a   : > { %v187_v1 = vld [vmem:[%s1652_s9] sm:$0xff]  ;;  %v188_v2 = vld [vmem:[%s1652_s9 + $0x8] sm:$0xff]  ;;  %v1726_v19 = vld [vmem:[#allocation2 + $0x178] sm:$0xff]  ;;  %s1999_s8 = scalar_lea.sflag [#allocation4], %s177_s25  ;;  %s1490_s16 = scalar_lea.vmem %s1990_s30, 512 }
  0x2b   : > { %1192 = vmatprep.mubr.msk.f32.mxu1 %vm195_vm0, %v187_v1  ;;  %v1728_v20 = vld [vmem:[#allocation2 + $0x170] sm:$0xff]  ;;  %1230 = vmatprep.subr.mxu0 %v1726_v19  ;;  %v1732_v21 = vld [vmem:[#allocation2 + $0x168] sm:$0xff]  ;;  %v1736_v22 = vld [vmem:[#allocation2 + $0x160] sm:$0xff]  ;;  %p1491_p6 = scmp.ne.s32.totalorder %s1990_s30, %s1490_s16 }
  0x2c   : > { %1193 = vmatmul.mubr.msk.f32.vlgmr.msra.gmra.mxu1 %vm195_vm0, %v188_v2  ;;  %1231 = vmatpush3.msra.mxu0 %v1726_v19  ;;  %v1740_v23 = vld [vmem:[#allocation2 + $0x158] sm:$0xff]  ;;  %v1744_v24 = vld [vmem:[#allocation2 + $0x150] sm:$0xff]  ;;  %v1748_v25 = vld [vmem:[#allocation2 + $0x148] sm:$0xff] }
  0x2d   : > { %1196 = vmatpush3.msra.mxu1 %v1660_v3  ;;  %1232 = vmatprep.subr.mxu0 %v1728_v20  ;;  %v1752_v26 = vld [vmem:[#allocation2 + $0x140] sm:$0xff]  ;;  %v1756_v27 = vld [vmem:[#allocation2 + $0x138] sm:$0xff]  ;;  %v1760_v28 = vld [vmem:[#allocation2 + $0x130] sm:$0xff]  ;;  %p1492_p9 = pnand %p1491_p6, %p1620_p5 }
  0x2e   : > { %1197 = vmatprep.subr.mxu1 %v1663_v4  ;;  %1233 = vmatpush3.msra.mxu0 %v1728_v20  ;;  %v1764_v29 = vld [vmem:[#allocation2 + $0x128] sm:$0xff]  ;;  %v1768_v30 = vld [vmem:[#allocation2 + $0x120] sm:$0xff]  ;;  %v1772_v31 = vld [vmem:[#allocation2 + $0x118] sm:$0xff] }
  0x2f   : > { %1198 = vmatpush3.msra.mxu1 %v1663_v4  ;;  %1234 = vmatprep.subr.mxu0 %v1732_v21  ;;  %v1781_v32 = vld [vmem:[%s2041_s2] ss:$0 sm:$0xff]  ;;  %v1785_v39 = vld [vmem:[#allocation2 + $0x110] sm:$0xff]  ;;  %v1789_v40 = vld [vmem:[#allocation2 + $0x108] sm:$0xff]  ;;  %p1493_p10 = pneg %p1492_p9 }
  0x30   : > { %1199 = vmatprep.subr.mxu1 %v1668_v5  ;;  %1235 = vmatpush3.msra.mxu0 %v1732_v21  ;;  %v1791_v41 = vld [vmem:[#allocation2 + $0x100] sm:$0xff]  ;;  %v1798_v42 = vld [vmem:[#allocation2 + $0x1f8] sm:$0xff]  ;;  %v1800_v43 = vld [vmem:[#allocation2 + $0x1f0] sm:$0xff] }
  0x31   : > { %1200 = vmatpush3.msra.mxu1 %v1668_v5  ;;  %1236 = vmatprep.subr.mxu0 %v1736_v22  ;;  %v1804_v44 = vld [vmem:[#allocation2 + $0x1e8] sm:$0xff]  ;;  %v1808_v45 = vld [vmem:[#allocation2 + $0x1e0] sm:$0xff]  ;;  %v1812_v46 = vld [vmem:[#allocation2 + $0x1d8] sm:$0xff] }
  0x32   : > { %1201 = vmatprep.subr.mxu1 %v1672_v6  ;;  %1237 = vmatpush3.msra.mxu0 %v1736_v22  ;;  %v1816_v47 = vld [vmem:[#allocation2 + $0x1d0] sm:$0xff]  ;;  %v1820_v48 = vld [vmem:[#allocation2 + $0x1c8] sm:$0xff]  ;;  %v1824_v49 = vld [vmem:[#allocation2 + $0x1c0] sm:$0xff] }
  0x33   : > { %1202 = vmatpush3.msra.mxu1 %v1672_v6  ;;  %1238 = vmatprep.subr.mxu0 %v1740_v23  ;;  %v1828_v50 = vld [vmem:[#allocation2 + $0x1b8] sm:$0xff]  ;;  %v1832_v51 = vld [vmem:[#allocation2 + $0x1b0] sm:$0xff]  ;;  %v1836_v52 = vld [vmem:[#allocation2 + $0x1a8] sm:$0xff] }
  0x34   : > { %1203 = vmatprep.subr.mxu1 %v1676_v7  ;;  %1239 = vmatpush3.msra.mxu0 %v1740_v23  ;;  %v1840_v53 = vld [vmem:[#allocation2 + $0x1a0] sm:$0xff]  ;;  %v576_v61 = vld [vmem:[%s1652_s9 + $0x10] sm:$0xff]  ;;  %v577_v62 = vld [vmem:[%s1652_s9 + $0x18] sm:$0xff]  ;;  %s1559_s9 = smov [#allocation5]  }
  0x35   : > { %1204 = vmatpush3.msra.mxu1 %v1676_v7  ;;  %1240 = vmatprep.subr.mxu0 %v1744_v24  ;;  %v1849_v54 = vld [vmem:[%s2041_s2 + $0x1] ss:$0 sm:$0xff]  ;;  %v1891_v63 = vld [vmem:[#allocation2 + $0x198] sm:$0xff]  ;;  %v1899_v1 = vld [vmem:[#allocation2 + $0x188] sm:$0xff]  ;;  %s1494_s10 = sshll.u32 %s1559_s9, 4  ;;  %s1495_s10 = int_to_ptr.vmem [resolvable:$false] %s1494_s10 }
  0x36   : > { %1205 = vmatprep.subr.mxu1 %v1680_v8  ;;  %1241 = vmatpush3.msra.mxu0 %v1744_v24  ;;  %v1903_v2 = vld [vmem:[#allocation2 + $0x180] sm:$0xff]  ;;  %s1496_s11 = scalar_lea.vmem %s1495_s10, 1024  ;;  %p1497_p11 = scmp.lt.s32.totalorder %s1990_s30, %s1495_s10 }
  0x37   : > { %1206 = vmatpush3.msra.mxu1 %v1680_v8  ;;  %1242 = vmatprep.subr.mxu0 %v1748_v25  ;;  %p1498_p12 = scmp.lt.s32.totalorder %s1496_s11, %s1490_s16 }
  0x38   : > { %1207 = vmatprep.subr.mxu1 %v1684_v9  ;;  %1243 = vmatpush3.msra.mxu0 %v1748_v25 }
  0x39   : > { %1208 = vmatpush3.msra.mxu1 %v1684_v9  ;;  %1244 = vmatprep.subr.mxu0 %v1752_v26  ;;  %p1499_p13 = por %p1498_p12, %p1497_p11 }
  0x3a   : > { %1209 = vmatprep.subr.mxu1 %v1688_v10  ;;  %1245 = vmatpush3.msra.mxu0 %v1752_v26 }
  0x3b   : > { %1210 = vmatpush3.msra.mxu1 %v1688_v10  ;;  %1246 = vmatprep.subr.mxu0 %v1756_v27  ;;  %p1500_p0 = pnand %p1499_p13, %p1493_p10 }
  0x3c   : > { %1211 = vmatprep.subr.mxu1 %v1692_v11  ;;  %1247 = vmatpush3.msra.mxu0 %v1756_v27 }
  0x3d   : > { %1212 = vmatpush3.msra.mxu1 %v1692_v11  ;;  %1248 = vmatprep.subr.mxu0 %v1760_v28 }
  0x3e   : > { %1213 = vmatprep.subr.mxu1 %v1696_v12  ;;  %1249 = vmatpush3.msra.mxu0 %v1760_v28 }
  0x3f   : > { %1214 = vmatpush3.msra.mxu1 %v1696_v12  ;;  %1250 = vmatprep.subr.mxu0 %v1764_v29 }
  0x40   : > { %1215 = vmatprep.subr.mxu1 %v1700_v13  ;;  %1251 = vmatpush3.msra.mxu0 %v1764_v29 }
  0x41   : > { %1216 = vmatpush3.msra.mxu1 %v1700_v13  ;;  %1252 = vmatprep.subr.mxu0 %v1768_v30 }
  0x42   : > { %1217 = vmatprep.subr.mxu1 %v1704_v14  ;;  %1253 = vmatpush3.msra.mxu0 %v1768_v30 }
  0x43   : > { %1218 = vmatpush3.msra.mxu1 %v1704_v14  ;;  %1254 = vmatprep.subr.mxu0 %v1772_v31 }
  0x44   : > { %1219 = vmatprep.subr.mxu1 %v1710_v15  ;;  %1255 = vmatpush3.msra.mxu0 %v1772_v31 }
  0x45   : > { %1220 = vmatpush3.msra.mxu1 %v1710_v15  ;;  %1256 = vmatprep.subr.mxu0 %v1785_v39 }
  0x46   : > { %1221 = vmatprep.subr.mxu1 %v1714_v16  ;;  %1257 = vmatpush3.msra.mxu0 %v1785_v39 }
  0x47   : > { %1222 = vmatpush3.msra.mxu1 %v1714_v16  ;;  %1258 = vmatprep.subr.mxu0 %v1789_v40 }
  0x48   : > { %1223 = vmatprep.subr.mxu1 %v1718_v17  ;;  %1259 = vmatpush3.msra.mxu0 %v1789_v40 }
  0x49   : > { %1224 = vmatpush3.msra.mxu1 %v1718_v17  ;;  %1260 = vmatprep.subr.mxu0 %v1791_v41 }
  0x4a   : > { %1225 = vmatprep.subr.mxu1 %v1722_v18  ;;  %1261 = vmatpush3.msra.mxu0 %v1791_v41 }
  0x4b   : > { %1226 = vmatpush3.msra.mxu1 %v1722_v18  ;;  %1300 = vmatprep.subr.mxu0 %v1654_v0 }
  0x4c   : > { %1265 = vmatprep.subr.mxu1 %v1798_v42 }
  0xec   : > { %v1194_v33 = vpop.f32.mrf.mxu1 }
  0xed   : > { %v274_v34 = vadd.f32 %v1194_v33, %v1781_v32 }
  0xee   : > { %v268_v35 = vpop.f32.mrf.mxu1 }
  0xef   : > { %v269_v36 = vadd.f32 %v1781_v32, %v268_v35  ;;  %v278_v38 = vmax.f32 %v274_v34, 0.0 }
  0xf1   : > { %v277_v37 = vmax.f32 %v269_v36, 0.0 }
  0xf3   : > { %1227 = vmatprep.mubr.f32.mxu1 %v277_v37 }
  0xf4   : > { %1228 = vmatmul.mubr.f32.vlgmr.msra.gmra.mxu1 %v278_v38 }
  0xf5   : > { %1266 = vmatpush3.msra.mxu1 %v1798_v42 }
  0xf6   : > { %1267 = vmatprep.subr.mxu1 %v1800_v43 }
  0xf7   : > { %1268 = vmatpush3.msra.mxu1 %v1800_v43 }
  0xf8   : > { %1269 = vmatprep.subr.mxu1 %v1804_v44 }
  0xf9   : > { %1270 = vmatpush3.msra.mxu1 %v1804_v44 }
  0xfa   : > { %1271 = vmatprep.subr.mxu1 %v1808_v45 }
  0xfb   : > { %1272 = vmatpush3.msra.mxu1 %v1808_v45 }
  0xfc   : > { %1273 = vmatprep.subr.mxu1 %v1812_v46 }
  0xfd   : > { %1274 = vmatpush3.msra.mxu1 %v1812_v46 }
  0xfe   : > { %1275 = vmatprep.subr.mxu1 %v1816_v47 }
  0xff   : > { %1276 = vmatpush3.msra.mxu1 %v1816_v47 }
 0x100   : > { %1277 = vmatprep.subr.mxu1 %v1820_v48 }
 0x101   : > { %1278 = vmatpush3.msra.mxu1 %v1820_v48 }
 0x102   : > { %1279 = vmatprep.subr.mxu1 %v1824_v49 }
 0x103   : > { %1280 = vmatpush3.msra.mxu1 %v1824_v49 }
 0x104   : > { %1281 = vmatprep.subr.mxu1 %v1828_v50 }
 0x105   : > { %1282 = vmatpush3.msra.mxu1 %v1828_v50 }
 0x106   : > { %1283 = vmatprep.subr.mxu1 %v1832_v51 }
 0x107   : > { %1284 = vmatpush3.msra.mxu1 %v1832_v51 }
 0x108   : > { %1285 = vmatprep.subr.mxu1 %v1836_v52 }
 0x109   : > { %1286 = vmatpush3.msra.mxu1 %v1836_v52 }
 0x10a   : > { %1287 = vmatprep.subr.mxu1 %v1840_v53 }
 0x10b   : > { %1288 = vmatpush3.msra.mxu1 %v1840_v53 }
 0x10c   : > { %1289 = vmatprep.subr.mxu1 %v1891_v63 }
 0x10d   : > { %1290 = vmatpush3.msra.mxu1 %v1891_v63 }
 0x1b4   : > { %v1229_v55 = vpop.f32.mrf.mxu1 }
 0x1b5   : > { %v373_v56 = vadd.f32 %v1229_v55, %v1849_v54 }
 0x1b6   : > { %v367_v57 = vpop.f32.mrf.mxu1 }
 0x1b7   : > { %v368_v58 = vadd.f32 %v1849_v54, %v367_v57  ;;  %v377_v60 = vmax.f32 %v373_v56, 0.0 }
 0x1b9   : > { %v376_v59 = vmax.f32 %v368_v58, 0.0 }
 0x1bb   : > { %1262 = vmatprep.mubr.f32.mxu0 %v376_v59 }
 0x1bc   : > { %1263 = vmatmul.mubr.f32.vlgmr.msra.gmra.mxu0 %v377_v60 }
 0x1bd   : > { %1301 = vmatpush3.msra.mxu0 %v1654_v0  ;;  %1302 = vmatprep.mubr.msk.f32.mxu0 %vm195_vm0, %v576_v61  ;;  %v1895_v0 = vld [vmem:[#allocation2 + $0x190] sm:$0xff] }
 0x1be   : > { %1305 = vmatprep.subr.mxu0 %v1660_v3  ;;  %1291 = vmatprep.subr.mxu1 %v1895_v0 }
 0x1bf   : > { %1292 = vmatpush3.msra.mxu1 %v1895_v0 }
 0x1c0   : > { %1303 = vmatmul.mubr.msk.f32.vlgmr.msra.gmra.mxu0 %vm195_vm0, %v577_v62  ;;  %1293 = vmatprep.subr.mxu1 %v1899_v1 }
 0x1c1   : > { %1306 = vmatpush3.msra.mxu0 %v1660_v3  ;;  %1294 = vmatpush3.msra.mxu1 %v1899_v1  ;;  %v1911_v3 = vld [vmem:[%s2041_s2 + $0x2] ss:$0 sm:$0xff] }
 0x1c2   : > { %1307 = vmatprep.subr.mxu0 %v1663_v4  ;;  %1295 = vmatprep.subr.mxu1 %v1903_v2 }
 0x1c3   : > { %1308 = vmatpush3.msra.mxu0 %v1663_v4  ;;  %1296 = vmatpush3.msra.mxu1 %v1903_v2 }
 0x1c4   : > { %1309 = vmatprep.subr.mxu0 %v1668_v5  ;;  %1340 = vmatprep.subr.mxu1 %v1726_v19 }
 0x1c5   : > { %1310 = vmatpush3.msra.mxu0 %v1668_v5 }
 0x1c6   : > { %1311 = vmatprep.subr.mxu0 %v1672_v6 }
 0x1c7   : > { %1312 = vmatpush3.msra.mxu0 %v1672_v6 }
 0x1c8   : > { %1313 = vmatprep.subr.mxu0 %v1676_v7 }
 0x1c9   : > { %1314 = vmatpush3.msra.mxu0 %v1676_v7 }
 0x1ca   : > { %1315 = vmatprep.subr.mxu0 %v1680_v8 }
 0x1cb   : > { %1316 = vmatpush3.msra.mxu0 %v1680_v8 }
 0x1cc   : > { %1317 = vmatprep.subr.mxu0 %v1684_v9 }
 0x1cd   : > { %1318 = vmatpush3.msra.mxu0 %v1684_v9 }
 0x1ce   : > { %1319 = vmatprep.subr.mxu0 %v1688_v10 }
 0x1cf   : > { %1320 = vmatpush3.msra.mxu0 %v1688_v10 }
 0x1d0   : > { %1321 = vmatprep.subr.mxu0 %v1692_v11 }
 0x1d1   : > { %1322 = vmatpush3.msra.mxu0 %v1692_v11 }
 0x1d2   : > { %1323 = vmatprep.subr.mxu0 %v1696_v12 }
 0x1d3   : > { %1324 = vmatpush3.msra.mxu0 %v1696_v12 }
 0x1d4   : > { %1325 = vmatprep.subr.mxu0 %v1700_v13 }
 0x1d5   : > { %1326 = vmatpush3.msra.mxu0 %v1700_v13 }
 0x1d6   : > { %1327 = vmatprep.subr.mxu0 %v1704_v14 }
 0x1d7   : > { %1328 = vmatpush3.msra.mxu0 %v1704_v14 }
 0x1d8   : > { %1329 = vmatprep.subr.mxu0 %v1710_v15 }
 0x1d9   : > { %1330 = vmatpush3.msra.mxu0 %v1710_v15 }
 0x1da   : > { %1331 = vmatprep.subr.mxu0 %v1714_v16 }
 0x1db   : > { %1332 = vmatpush3.msra.mxu0 %v1714_v16  ;;  %v1063_v16 = vld [vmem:[%s2041_s2 + $0x3] ss:$0 sm:$0xff] }
 0x1dc   : > { %1333 = vmatprep.subr.mxu0 %v1718_v17 }
 0x1dd   : > { %1334 = vmatpush3.msra.mxu0 %v1718_v17 }
 0x1de   : > { %1335 = vmatprep.subr.mxu0 %v1722_v18 }
 0x1df   : > { %1336 = vmatpush3.msra.mxu0 %v1722_v18 }
 0x1e0   : > { %1375 = vmatprep.subr.mxu0 %v1798_v42 }
 0x27c   : > { %v1264_v4 = vpop.f32.mrf.mxu0 }
 0x27d   : > { %v472_v5 = vadd.f32 %v1264_v4, %v1911_v3 }
 0x27e   : > { %v466_v6 = vpop.f32.mrf.mxu0 }
 0x27f   : > { %v467_v7 = vadd.f32 %v1911_v3, %v466_v6  ;;  %v476_v10 = vmax.f32 %v472_v5, 0.0 }
 0x280   : > { %v1304_v8 = vpop.f32.mrf.mxu0 }
 0x281   : > { %v475_v9 = vmax.f32 %v467_v7, 0.0  ;;  %v662_v11 = vadd.f32 %v1304_v8, %v1781_v32 }
 0x282   : > { %v656_v12 = vpop.f32.mrf.mxu0 }
 0x283   : > { %v657_v13 = vadd.f32 %v1781_v32, %v656_v12  ;;  %1297 = vmatprep.mubr.f32.mxu1 %v475_v9  ;;  %v666_v15 = vmax.f32 %v662_v11, 0.0 }
 0x284   : > { %1298 = vmatmul.mubr.f32.vlgmr.msra.gmra.mxu1 %v476_v10 }
 0x285   : > { %v665_v14 = vmax.f32 %v657_v13, 0.0  ;;  %1341 = vmatpush3.msra.mxu1 %v1726_v19 }
 0x286   : > { %1342 = vmatprep.subr.mxu1 %v1728_v20 }
 0x287   : > { %1337 = vmatprep.mubr.f32.mxu0 %v665_v14  ;;  %1343 = vmatpush3.msra.mxu1 %v1728_v20 }
 0x288   : > { %1338 = vmatmul.mubr.f32.vlgmr.msra.gmra.mxu0 %v666_v15  ;;  %1344 = vmatprep.subr.mxu1 %v1732_v21 }
 0x289   : > { %1345 = vmatpush3.msra.mxu1 %v1732_v21  ;;  %1376 = vmatpush3.msra.mxu0 %v1798_v42 }
 0x28a   : > { %1346 = vmatprep.subr.mxu1 %v1736_v22  ;;  %1377 = vmatprep.subr.mxu0 %v1800_v43 }
 0x28b   : > { %1347 = vmatpush3.msra.mxu1 %v1736_v22  ;;  %1378 = vmatpush3.msra.mxu0 %v1800_v43 }
 0x28c   : > { %1348 = vmatprep.subr.mxu1 %v1740_v23  ;;  %1379 = vmatprep.subr.mxu0 %v1804_v44 }
 0x28d   : > { %1349 = vmatpush3.msra.mxu1 %v1740_v23  ;;  %1380 = vmatpush3.msra.mxu0 %v1804_v44 }
 0x28e   : > { %1350 = vmatprep.subr.mxu1 %v1744_v24  ;;  %1381 = vmatprep.subr.mxu0 %v1808_v45 }
 0x28f   : > { %1351 = vmatpush3.msra.mxu1 %v1744_v24  ;;  %1382 = vmatpush3.msra.mxu0 %v1808_v45 }
 0x290   : > { %1352 = vmatprep.subr.mxu1 %v1748_v25  ;;  %1383 = vmatprep.subr.mxu0 %v1812_v46 }
 0x291   : > { %1353 = vmatpush3.msra.mxu1 %v1748_v25  ;;  %1384 = vmatpush3.msra.mxu0 %v1812_v46 }
 0x292   : > { %1354 = vmatprep.subr.mxu1 %v1752_v26  ;;  %1385 = vmatprep.subr.mxu0 %v1816_v47 }
 0x293   : > { %1355 = vmatpush3.msra.mxu1 %v1752_v26  ;;  %1386 = vmatpush3.msra.mxu0 %v1816_v47 }
 0x294   : > { %1356 = vmatprep.subr.mxu1 %v1756_v27  ;;  %1387 = vmatprep.subr.mxu0 %v1820_v48 }
 0x295   : > { %1357 = vmatpush3.msra.mxu1 %v1756_v27  ;;  %1388 = vmatpush3.msra.mxu0 %v1820_v48 }
 0x296   : > { %1358 = vmatprep.subr.mxu1 %v1760_v28  ;;  %1389 = vmatprep.subr.mxu0 %v1824_v49 }
 0x297   : > { %1359 = vmatpush3.msra.mxu1 %v1760_v28  ;;  %1390 = vmatpush3.msra.mxu0 %v1824_v49 }
 0x298   : > { %1360 = vmatprep.subr.mxu1 %v1764_v29  ;;  %1391 = vmatprep.subr.mxu0 %v1828_v50 }
 0x299   : > { %1361 = vmatpush3.msra.mxu1 %v1764_v29  ;;  %1392 = vmatpush3.msra.mxu0 %v1828_v50 }
 0x29a   : > { %1362 = vmatprep.subr.mxu1 %v1768_v30  ;;  %1393 = vmatprep.subr.mxu0 %v1832_v51 }
 0x29b   : > { %1363 = vmatpush3.msra.mxu1 %v1768_v30  ;;  %1394 = vmatpush3.msra.mxu0 %v1832_v51 }
 0x29c   : > { %1364 = vmatprep.subr.mxu1 %v1772_v31  ;;  %1395 = vmatprep.subr.mxu0 %v1836_v52 }
 0x29d   : > { %1365 = vmatpush3.msra.mxu1 %v1772_v31  ;;  %1396 = vmatpush3.msra.mxu0 %v1836_v52 }
 0x29e   : > { %1366 = vmatprep.subr.mxu1 %v1785_v39  ;;  %1397 = vmatprep.subr.mxu0 %v1840_v53 }
 0x29f   : > { %1367 = vmatpush3.msra.mxu1 %v1785_v39  ;;  %1398 = vmatpush3.msra.mxu0 %v1840_v53 }
 0x2a0   : > { %1368 = vmatprep.subr.mxu1 %v1789_v40  ;;  %1399 = vmatprep.subr.mxu0 %v1891_v63 }
 0x2a1   : > { %1369 = vmatpush3.msra.mxu1 %v1789_v40  ;;  %1400 = vmatpush3.msra.mxu0 %v1891_v63 }
 0x2a2   : > { %1370 = vmatprep.subr.mxu1 %v1791_v41  ;;  %1401 = vmatprep.subr.mxu0 %v1895_v0 }
 0x2a3   : > { %1371 = vmatpush3.msra.mxu1 %v1791_v41  ;;  %1402 = vmatpush3.msra.mxu0 %v1895_v0 }
 0x2a4   : > { %1403 = vmatprep.subr.mxu0 %v1899_v1 }
 0x2a5   : > { %1404 = vmatpush3.msra.mxu0 %v1899_v1 }
 0x2a6   : > { %1405 = vmatprep.subr.mxu0 %v1903_v2 }
 0x2a7   : > { %1406 = vmatpush3.msra.mxu0 %v1903_v2 }
 0x344   : > { %v1299_v17 = vpop.f32.mrf.mxu1 }
 0x345   : > { %v571_v18 = vadd.f32 %v1299_v17, %v1063_v16 }
 0x346   : > { %v565_v19 = vpop.f32.mrf.mxu1 }
 0x347   : > { %575 = vst [vmem:[%s179_s29 + $0x8] sm:$0xff] %v571_v18  ;;  %v566_v20 = vadd.f32 %v1063_v16, %v565_v19 }
 0x348   : > { %v1339_v21 = vpop.f32.mrf.mxu0 }
 0x349   : > { %574 = vst [vmem:[%s179_s29] sm:$0xff] %v566_v20  ;;  %v760_v22 = vadd.f32 %v1339_v21, %v1849_v54 }
 0x34a   : > { %v754_v23 = vpop.f32.mrf.mxu0 }
 0x34b   : > { %v755_v24 = vadd.f32 %v1849_v54, %v754_v23  ;;  %v764_v26 = vmax.f32 %v760_v22, 0.0 }
 0x34d   : > { %v763_v25 = vmax.f32 %v755_v24, 0.0 }
 0x34f   : > { %1372 = vmatprep.mubr.f32.mxu1 %v763_v25 }
 0x350   : > { %1373 = vmatmul.mubr.f32.vlgmr.msra.gmra.mxu1 %v764_v26 }
 0x410   : > { %v1374_v27 = vpop.f32.mrf.mxu1 }
 0x411   : > { %v858_v28 = vadd.f32 %v1374_v27, %v1911_v3 }
 0x412   : > { %v852_v29 = vpop.f32.mrf.mxu1 }
 0x413   : > { %v853_v30 = vadd.f32 %v1911_v3, %v852_v29  ;;  %v862_v32 = vmax.f32 %v858_v28, 0.0 }
 0x415   : > { %v861_v31 = vmax.f32 %v853_v30, 0.0 }
 0x417   : > { %1407 = vmatprep.mubr.f32.mxu0 %v861_v31 }
 0x418   : > { %1408 = vmatmul.mubr.f32.vlgmr.msra.gmra.mxu0 %v862_v32 }
 0x4d8   : > { %v1409_v33 = vpop.f32.mrf.mxu0 }
 0x4d9   : > { %v956_v34 = vadd.f32 %v1409_v33, %v1063_v16 }
 0x4da   : > { %v950_v35 = vpop.f32.mrf.mxu0 }
 0x4db   : > { %960 = vst [vmem:[%s179_s29 + $0x18] sm:$0xff] %v956_v34  ;;  %v951_v36 = vadd.f32 %v1063_v16, %v950_v35 }
 0x4dd   : > { %959 = vst [vmem:[%s179_s29 + $0x10] sm:$0xff] %v951_v36 }
 0x4de   : > { %1503 = shalt.err (!%p1500_p0)
}
 0x4df   : > { %s1504_s17 = scalar_lea.hbm %s1995_s7, 512  ;;  %s1508_s24 = scalar_lea.hbm %s2042_s3, 1024 }
 0x4e0   : > { %p1505_p1 = scmp.ne.s32.totalorder %s1995_s7, %s1504_s17  ;;  %p1509_p4 = scmp.lt.s32.totalorder %s1995_s7, %s2042_s3 }
 0x4e1   : > { %p1510_p7 = scmp.lt.s32.totalorder %s1508_s24, %s1504_s17 }
 0x4e2   : > { %p1506_p2 = pnand %p1505_p1, %p1620_p5 }
 0x4e3   : > { %p1511_p8 = por %p1510_p7, %p1509_p4 }
 0x4e4   : > { %p1507_p3 = pneg %p1506_p2 }
 0x4e6   : > { %p1512_p6 = pnand %p1511_p8, %p1507_p3 }
 0x4e8   : > { %1515 = shalt.err (!%p1512_p6)
}
 0x4e9   : > { %s1560_s27 = smov 128   ;;  %s1561_s28 = smov 8  }
 0x4ea   : > { %1414 = dma.vmem_to_hbm [thread:$0]  (%p1620_p5), %s1990_s30, 512, %s1995_s7, %s1999_s8, %s1560_s27, %s1560_s27, %s1561_s28  }
 0x4eb PF: > { %p1426_p9 = scmp.ge.s32.totalorder %s1554_s15, 2  ;;  %s990_s29 = sand.u32 1, %s1542_s12  }
 0x4ec   : > { %p2046_p10 = scmp.ne.s32.totalorder %s2044_s23, 0  ;;  %s991_s4 = scalar_lea.sflag [#allocation4], %s990_s29 }
 0x4ee   : > { %p1421_p11 = pnand %p1426_p9, %p2046_p10 }
 0x4f0   : > { %p1422_p12 = pneg %p1421_p11 }
 0x4f2   : > { %1537 = dma.done.wait (%p1422_p12), %s991_s4, 512  }
 0x4f3   : > { %1539 = vsyncadd (%p1422_p12), %s991_s4, 4294966784  ;;  %p14_p13 = scmp.ge.s32.totalorder %s1607_s18, 4   ;;  %s2047_s12 = smov %s1546_s13 }
 0x4f4   : > { %s2048_s13 = smov %s1550_s14  ;;  %s2049_s14 = smov %s1618_s21 }
 0x4f5   : > { %s2050_s15 = smov %s1607_s18  ;;  %16 = sbr.rel (!%p14_p13) target bundleno = 4 (0x4), region = 75 }
 0x4fa   :  { %996 = vsyncpa [#allocation3], 1 }
 0x4fb   :  { %998 = vsyncpa [#allocation3 + $0x1], 1 }
 0x4fc   :  { %999 = vsyncpa [#allocation4], 1 }
 0x4fd   :  { %1001 = vsyncpa [#allocation4 + $0x1], 1 }

</bundles_post_ra>
